<compile_context>
chip_gen: v7x
topology: tpu7x:2x2x1
jax: 0.10.0
libtpu: 0.0.40
codegen_flags: <defaults>
</compile_context>

<pallas_src>
import functools

import jax
import jax.numpy as jnp
from jax.experimental import pallas as pl
from jax.experimental.pallas import tpu as pltpu


# --------------------------------------------------------------------------
# Generation-aware VMEM budgets.
# --------------------------------------------------------------------------
def _vmem_budgets():
    """Returns (scoped vmem_limit_bytes, working-set budget bytes)."""
    phys = None
    try:
        phys = getattr(pltpu.get_tpu_info(), "vmem_capacity_bytes", None)
    except Exception:
        phys = None
    if phys is None:
        phys = 64 * 1024 * 1024  # conservative default (v7x per-TC VMEM)
    if phys >= 96 * 1024 * 1024:
        # v5e / v6e: 128 MiB physical VMEM.
        return 64 * 1024 * 1024, 48 * 1024 * 1024
    # v7x: 64 MiB physical VMEM per TensorCore.
    return 32 * 1024 * 1024, 24 * 1024 * 1024


def _sublane_align(itemsize):
    # Sub-32-bit dtypes pack rows along sublanes: bf16 -> 16, int8/fp8 -> 32.
    return max(8, 32 // max(int(itemsize), 1))


# --------------------------------------------------------------------------
# Fused single-sweep path: stats + apply in one HBM read + one HBM write.
# --------------------------------------------------------------------------
def _choose_fused_tc(N, C, L, in_elem, out_elem, budget):
    """Largest legal channel tile whose fused working set fits `budget`."""
    # Per-channel bytes: double-buffered input + output blocks plus ~3 f32
    # temporaries (x_f32 / centered x / pre-cast result) possibly live in VMEM.
    per_c = N * L * (2 * in_elem + 2 * out_elem + 12)
    cands = sorted({C} | set(range(8, C + 1, 8)), reverse=True)
    # Prefer tiles leaving >= 2 grid blocks so the 'parallel' channel axis can
    # shard across v7x's two TensorCores.
    preferred = [t for t in cands if pl.cdiv(C, t) >= 2] if C >= 16 else []
    for tc in preferred + cands:
        if per_c * tc <= budget:
            return tc
    return None


def _fused_bn_kernel(x_ref, g_ref, b_ref, o_ref, *, eps, inv_count):
    # x_ref: (N, TC, L); g_ref / b_ref: (TC, 1); o_ref: (N, TC, L).
    x = x_ref[...].astype(jnp.float32)
    s = jnp.sum(x, axis=0)                                  # (TC, L), VPU adds
    mean = jnp.sum(s, axis=1, keepdims=True) * inv_count    # (TC, 1), one XLU reduce
    xc = x - mean[None]                                     # centered -> no cancellation
    sq = jnp.sum(xc * xc, axis=0)                           # (TC, L)
    var = jnp.sum(sq, axis=1, keepdims=True) * inv_count    # (TC, 1)
    scale = g_ref[...].astype(jnp.float32) * jax.lax.rsqrt(var + eps)
    shift = b_ref[...].astype(jnp.float32)
    o_ref[...] = (xc * scale[None] + shift[None]).astype(o_ref.dtype)


def _fused_path(x, gamma, beta, eps, tc, vmem_limit):
    N, C, H, W = x.shape
    L = H * W
    x3 = x.reshape(N, C, L)                                 # free reshape, no transpose
    g2 = gamma.astype(jnp.float32).reshape(C, 1)
    b2 = beta.astype(jnp.float32).reshape(C, 1)
    n_c = pl.cdiv(C, tc)
    kernel = functools.partial(
        _fused_bn_kernel, eps=float(eps), inv_count=1.0 / float(N * L))
    out3 = pl.pallas_call(
        kernel,
        out_shape=jax.ShapeDtypeStruct((N, C, L), x.dtype),
        grid=(n_c,),
        in_specs=[
            pl.BlockSpec((N, tc, L), lambda c: (0, c, 0)),
            pl.BlockSpec((tc, 1), lambda c: (c, 0)),
            pl.BlockSpec((tc, 1), lambda c: (c, 0)),
        ],
        out_specs=pl.BlockSpec((N, tc, L), lambda c: (0, c, 0)),
        compiler_params=pltpu.CompilerParams(
            dimension_semantics=("parallel",),
            vmem_limit_bytes=vmem_limit,
        ),
    )(x3, g2, b2)
    return out3.reshape(N, C, H, W)


# --------------------------------------------------------------------------
# Two-pass streaming fallback (slab does not fit VMEM).
# --------------------------------------------------------------------------
def _pick_tiles(R, L, sub, per_elem, budget, max_tl=2048, max_tr=512):
    # Lane tile: multiple of 128 (lane-dense stores); full extent if L < 128.
    if L <= 128:
        tl = L
    else:
        tl = max(min(max_tl, (L // 128) * 128), 128)
        while tl > 128 and sub * tl * per_elem > budget:
            tl -= 128
    # Row tile: aligned to the dtype's sublane packing; keep >= 2 row blocks
    # when possible so the 'parallel' axis can shard across v7x TensorCores.
    if R <= sub:
        tr = R
    else:
        if R >= 2 * sub:
            tr = min(max_tr, max((R // 2 // sub) * sub, sub))
        else:
            tr = sub
        while tr > sub and tr * tl * per_elem > budget:
            tr -= sub
    return tr, tl, pl.cdiv(R, tr), pl.cdiv(L, tl)


def _stats_kernel(x_ref, sum_ref, sq_ref, ps_ref, pq_ref, *, L, TL, n_l):
    # x_ref: (TR, TL); sum_ref/sq_ref: (TR, 1) resident over the 'arbitrary'
    # L axis; ps_ref/pq_ref: (TR, lanes) f32 lane-parallel partial accumulators.
    li = pl.program_id(1)

    @pl.when(li == 0)
    def _init():
        ps_ref[...] = jnp.zeros_like(ps_ref)
        pq_ref[...] = jnp.zeros_like(pq_ref)

    x = x_ref[...].astype(jnp.float32)
    if L % TL != 0:
        # Mask the clipped tail tile so padded lanes don't pollute the sums.
        col = li * TL + jax.lax.broadcasted_iota(jnp.int32, x.shape, 1)
        x = jnp.where(col < L, x, 0.0)

    lanes = ps_ref.shape[1]
    ps = x[:, 0:lanes]
    pq = ps * ps
    for i in range(1, TL // lanes):              # vreg-aligned slices, VPU adds
        xi = x[:, i * lanes:(i + 1) * lanes]
        ps = ps + xi
        pq = pq + xi * xi
    ps_ref[...] += ps
    pq_ref[...] += pq

    @pl.when(li == n_l - 1)
    def _finish():                               # one cross-lane reduce per row sweep
        sum_ref[...] = jnp.sum(ps_ref[...], axis=1, keepdims=True)
        sq_ref[...] = jnp.sum(pq_ref[...], axis=1, keepdims=True)


def _apply_kernel(x_ref, scale_ref, shift_ref, o_ref):
    # Single fused FMA per element: y = x * scale + shift.
    y = x_ref[...].astype(jnp.float32) * scale_ref[...] + shift_ref[...]
    o_ref[...] = y.astype(o_ref.dtype)


def _two_pass_path(x, gamma, beta, eps, budget, vmem_limit):
    N, C, H, W = x.shape
    L = H * W
    R = N * C
    x2 = x.reshape(R, L)                          # free reshape, no transpose
    in_elem = jnp.dtype(x.dtype).itemsize
    out_elem = in_elem
    sub = _sublane_align(in_elem)

    # ---- pass 1: per-(n, c) sum and sum-of-squares -------------------------
    # Working set ~ 2 double-buffered input tiles + ~2 f32 temporaries.
    tr1, tl1, nr1, nl1 = _pick_tiles(R, L, sub, 2 * in_elem + 8, budget)
    lanes1 = min(tl1, 128)
    stats = functools.partial(_stats_kernel, L=L, TL=tl1, n_l=nl1)
    sums, sqs = pl.pallas_call(
        stats,
        out_shape=(
            jax.ShapeDtypeStruct((R, 1), jnp.float32),
            jax.ShapeDtypeStruct((R, 1), jnp.float32),
        ),
        grid=(nr1, nl1),
        in_specs=[pl.BlockSpec((tr1, tl1), lambda r, l: (r, l))],
        out_specs=(
            pl.BlockSpec((tr1, 1), lambda r, l: (r, 0)),
            pl.BlockSpec((tr1, 1), lambda r, l: (r, 0)),
        ),
        scratch_shapes=[
            pltpu.VMEM((tr1, lanes1), jnp.float32),
            pltpu.VMEM((tr1, lanes1), jnp.float32),
        ],
        compiler_params=pltpu.CompilerParams(
            dimension_semantics=("parallel", "arbitrary"),
            vmem_limit_bytes=vmem_limit,
        ),
    )(x2)

    # ---- tiny cross-N combine + fold gamma/beta into scale/shift -----------
    # TODO(synk): E[x^2]-mean^2 can lose precision for |mean| >> std; the fused
    # path (the common case) computes variance from centered data instead.
    count = jnp.float32(N * L)
    sum_c = jnp.sum(sums.reshape(N, C), axis=0)
    sq_c = jnp.sum(sqs.reshape(N, C), axis=0)
    mean = sum_c / count
    var = jnp.maximum(sq_c / count - mean * mean, 0.0)        # biased variance
    scale_c = gamma.astype(jnp.float32) * jax.lax.rsqrt(var + eps)
    shift_c = beta.astype(jnp.float32) - mean * scale_c
    scale_r = jnp.tile(scale_c, (N,)).reshape(R, 1)
    shift_r = jnp.tile(shift_c, (N,)).reshape(R, 1)

    # ---- pass 2: fused normalize/affine apply (lane-dense output tiles) ----
    tr2, tl2, nr2, nl2 = _pick_tiles(
        R, L, sub, 2 * in_elem + 2 * out_elem + 4, budget)
    out2 = pl.pallas_call(
        _apply_kernel,
        out_shape=jax.ShapeDtypeStruct((R, L), x.dtype),
        grid=(nr2, nl2),
        in_specs=[
            pl.BlockSpec((tr2, tl2), lambda r, l: (r, l)),
            pl.BlockSpec((tr2, 1), lambda r, l: (r, 0)),
            pl.BlockSpec((tr2, 1), lambda r, l: (r, 0)),
        ],
        out_specs=pl.BlockSpec((tr2, tl2), lambda r, l: (r, l)),
        compiler_params=pltpu.CompilerParams(
            dimension_semantics=("parallel", "parallel"),
            vmem_limit_bytes=vmem_limit,
        ),
    )(x2, scale_r, shift_r)

    return out2.reshape(N, C, H, W)


# --------------------------------------------------------------------------
# Public entry point.
# --------------------------------------------------------------------------
def dir_batchnorm2d(x, gamma, beta, *, eps=1e-5, force_two_pass=False):
    """Forward of DirBatchNorm2D (training-mode batch statistics).

    x: (N, C, H, W) NCHW.  gamma / beta: (C,) = concat of the four BN params.
    """
    N, C, H, W = x.shape
    L = H * W
    vmem_limit, budget = _vmem_budgets()
    in_elem = jnp.dtype(x.dtype).itemsize
    out_elem = in_elem

    tc = None
    if not force_two_pass:
        tc = _choose_fused_tc(N, C, L, in_elem, out_elem, budget)
    if tc is not None:
        return _fused_path(x, gamma, beta, eps, tc, vmem_limit)
    return _two_pass_path(x, gamma, beta, eps, budget, vmem_limit)


def _reference(x, gamma, beta, eps=1e-5):
    """Pure-JAX reference reproducing the PyTorch forward (training mode)."""
    mean = jnp.mean(x, axis=(0, 2, 3), keepdims=True)
    var = jnp.mean((x - mean) ** 2, axis=(0, 2, 3), keepdims=True)
    xhat = (x - mean) / jnp.sqrt(var + eps)
    return xhat * gamma.reshape(1, -1, 1, 1) + beta.reshape(1, -1, 1, 1)


if __name__ == "__main__":
    # Module config: num_per_dir=1 -> C = 4 * num_per_dir = 4.
    num_per_dir = 1
    N, C, H, W = 2, 4 * num_per_dir, 16, 16

    key = jax.random.PRNGKey(0)
    kx, kg, kb, kx2, kg2, kb2 = jax.random.split(key, 6)

    x = jax.random.normal(kx, (N, C, H, W), dtype=jnp.float32)
    # Deterministic per-BN parameters: bn{1..4}.weight / .bias, each of shape
    # (num_per_dir,), concatenated along the channel axis.
    gammas = jax.random.uniform(kg, (4, num_per_dir), minval=0.5, maxval=1.5)
    betas = jax.random.uniform(kb, (4, num_per_dir), minval=-0.5, maxval=0.5)
    gamma = gammas.reshape(-1)   # (C,)
    beta = betas.reshape(-1)     # (C,)

    # Fused single-sweep path (the common case).
    out = jax.block_until_ready(dir_batchnorm2d(x, gamma, beta))
    ref = _reference(x, gamma, beta)
    assert out.shape == (N, C, H, W)
    assert jnp.allclose(out, ref, atol=1e-4, rtol=1e-4), "fused path mismatch"

    # Two-pass streaming fallback, exercised on an odd H*W (tail-lane masking,
    # cdiv grids, lane-parallel partial accumulators).
    N2, C2, H2, W2 = 2, 8, 12, 12
    x_b = jax.random.normal(kx2, (N2, C2, H2, W2), dtype=jnp.float32)
    g_b = jax.random.uniform(kg2, (C2,), minval=0.5, maxval=1.5)
    b_b = jax.random.uniform(kb2, (C2,), minval=-0.5, maxval=0.5)
    out_b = jax.block_until_ready(
        dir_batchnorm2d(x_b, g_b, b_b, force_two_pass=True))
    ref_b = _reference(x_b, g_b, b_b)
    assert jnp.allclose(out_b, ref_b, atol=1e-4, rtol=1e-4), "two-pass mismatch"

    print("KERNEL_OK")
</pallas_src>

<mosaic_0001>
module attributes {stable_mosaic.version = 11 : i64} {
  func.func @_fused_bn_kernel(%arg0: i32, %arg1: memref<2x4x256xf32, #tpu.memory_space<vmem>>, %arg2: memref<4x1xf32, #tpu.memory_space<vmem>>, %arg3: memref<4x1xf32, #tpu.memory_space<vmem>>, %arg4: memref<2x4x256xf32, #tpu.memory_space<vmem>>) attributes {dimension_semantics = [#tpu.dimension_semantics<parallel>], iteration_bounds = array<i64: 1>, scalar_prefetch = 0 : i64, scratch_operands = 0 : i64, tpu.core_type = #tpu.core_type<tc>, window_params = [{transform_indices = @transform_0, window_bounds = array<i64: 2, 4, 256>}, {transform_indices = @transform_1, window_bounds = array<i64: 4, 1>}, {transform_indices = @transform_2, window_bounds = array<i64: 4, 1>}, {transform_indices = @transform_3, window_bounds = array<i64: 2, 4, 256>}]} {
    %c0 = arith.constant 0 : index
    %c0_0 = arith.constant 0 : index
    %c0_1 = arith.constant 0 : index
    %0 = vector.load %arg1[%c0, %c0_0, %c0_1] : memref<2x4x256xf32, #tpu.memory_space<vmem>>, vector<2x4x256xf32>
    %cst = arith.constant dense<0.000000e+00> : vector<4x256xf32>
    %1 = vector.multi_reduction <add>, %0, %cst [0] : vector<2x4x256xf32> to vector<4x256xf32>
    %cst_2 = arith.constant dense<0.000000e+00> : vector<4xf32>
    %2 = vector.multi_reduction <add>, %1, %cst_2 [1] : vector<4x256xf32> to vector<4xf32>
    %3 = vector.shape_cast %2 : vector<4xf32> to vector<4x1xf32>
    %cst_3 = arith.constant 0.001953125 : f32
    %4 = vector.broadcast %cst_3 : f32 to vector<4x1xf32>
    %5 = arith.mulf %3, %4 : vector<4x1xf32>
    %6 = vector.shape_cast %5 : vector<4x1xf32> to vector<1x4x1xf32>
    %7 = vector.broadcast %6 : vector<1x4x1xf32> to vector<2x4x256xf32>
    %8 = arith.subf %0, %7 : vector<2x4x256xf32>
    %9 = arith.mulf %8, %8 : vector<2x4x256xf32>
    %cst_4 = arith.constant dense<0.000000e+00> : vector<4x256xf32>
    %10 = vector.multi_reduction <add>, %9, %cst_4 [0] : vector<2x4x256xf32> to vector<4x256xf32>
    %cst_5 = arith.constant dense<0.000000e+00> : vector<4xf32>
    %11 = vector.multi_reduction <add>, %10, %cst_5 [1] : vector<4x256xf32> to vector<4xf32>
    %12 = vector.shape_cast %11 : vector<4xf32> to vector<4x1xf32>
    %cst_6 = arith.constant 0.001953125 : f32
    %13 = vector.broadcast %cst_6 : f32 to vector<4x1xf32>
    %14 = arith.mulf %12, %13 : vector<4x1xf32>
    %c0_7 = arith.constant 0 : index
    %c0_8 = arith.constant 0 : index
    %15 = vector.load %arg2[%c0_7, %c0_8] : memref<4x1xf32, #tpu.memory_space<vmem>>, vector<4x1xf32>
    %cst_9 = arith.constant 9.99999974E-6 : f32
    %16 = vector.broadcast %cst_9 : f32 to vector<4x1xf32>
    %17 = arith.addf %14, %16 : vector<4x1xf32>
    %18 = math.rsqrt %17 : vector<4x1xf32>
    %19 = arith.mulf %15, %18 : vector<4x1xf32>
    %c0_10 = arith.constant 0 : index
    %c0_11 = arith.constant 0 : index
    %20 = vector.load %arg3[%c0_10, %c0_11] : memref<4x1xf32, #tpu.memory_space<vmem>>, vector<4x1xf32>
    %21 = vector.shape_cast %19 : vector<4x1xf32> to vector<1x4x1xf32>
    %22 = vector.broadcast %21 : vector<1x4x1xf32> to vector<2x4x256xf32>
    %23 = arith.mulf %8, %22 : vector<2x4x256xf32>
    %24 = vector.shape_cast %20 : vector<4x1xf32> to vector<1x4x1xf32>
    %25 = vector.broadcast %24 : vector<1x4x1xf32> to vector<2x4x256xf32>
    %26 = arith.addf %23, %25 : vector<2x4x256xf32>
    %c0_12 = arith.constant 0 : index
    %c0_13 = arith.constant 0 : index
    %c0_14 = arith.constant 0 : index
    %27 = vector.load %arg4[%c0_12, %c0_13, %c0_14] : memref<2x4x256xf32, #tpu.memory_space<vmem>>, vector<2x4x256xf32>
    tpu.vector_store %arg4[%c0_12, %c0_13, %c0_14], %26 {strides = array<i32>} : memref<2x4x256xf32, #tpu.memory_space<vmem>>, vector<2x4x256xf32>,
    return
  }
  func.func @transform_0(%arg0: i32) -> (i32, i32, i32) {
    %c0_i32 = arith.constant 0 : i32
    %c0_i32_0 = arith.constant 0 : i32
    %c0_i32_1 = arith.constant 0 : i32
    return %c0_i32, %arg0, %c0_i32_0 : i32, i32, i32
  }
  func.func @transform_1(%arg0: i32) -> (i32, i32) {
    %c0_i32 = arith.constant 0 : i32
    %c0_i32_0 = arith.constant 0 : i32
    return %arg0, %c0_i32 : i32, i32
  }
  func.func @transform_2(%arg0: i32) -> (i32, i32) {
    %c0_i32 = arith.constant 0 : i32
    %c0_i32_0 = arith.constant 0 : i32
    return %arg0, %c0_i32 : i32, i32
  }
  func.func @transform_3(%arg0: i32) -> (i32, i32, i32) {
    %c0_i32 = arith.constant 0 : i32
    %c0_i32_0 = arith.constant 0 : i32
    %c0_i32_1 = arith.constant 0 : i32
    return %c0_i32, %arg0, %c0_i32_0 : i32, i32, i32
  }
}

</mosaic_0001>

<bundles_post_ra>
// kernel: tpu_custom_call.1
= control target key start
LH: loop header
LB: loop body
LE: loop exit
PB: predicated region body
PF: predicated region fallthrough
CT: control target
= control target key end

     0   :  { %8 = vsyncpa [#allocation3], 0  ;;  %s267_s0 = inlined_call_operand.hbm [shape: f32[2,4,256], index: 0, kind: input, shape index: {}]   ;;  %s268_s1 = inlined_call_operand.vmem [shape: f32[4,1], index: 1, kind: input, shape index: {}]   ;;  %s269_s2 = inlined_call_operand.vmem [shape: f32[4,1], index: 2, kind: input, shape index: {}]   ;;  %s270_s3 = inlined_call_operand.hbm [shape: f32[2,4,256], index: 3, kind: output, shape index: {}]  }
   0x1   :  { %9 = vsyncpa [#allocation4], 0  ;;  %s193_s12 = smov [#allocation2]   ;;  %s145_s16 = scalar_lea.hbm %s267_s0, 256 }
   0x2   :  { %s15_s13 = sshll.u32 %s193_s12, 4  ;;  %p146_p0 = scmp.ne.s32.totalorder %s267_s0, %s145_s16  ;;  %s16_s13 = int_to_ptr.vmem [resolvable:$true] %s15_s13 }
   0x3   :  { %p149_p1 = scmp.lt.u32.totalorder %s145_s16, %s267_s0 }
   0x5   :  { %p151_p2 = pnand %p149_p1, %p146_p0 }
   0x7   :  { %154 = shalt.err (!%p151_p2)
}
   0x8   :  { %s155_s21 = scalar_lea.vmem %s16_s13, 256  ;;  %p160_p4 = scmp.lt.s32.totalorder %s16_s13, %s16_s13 }
   0x9   :  { %p156_p3 = scmp.ne.s32.totalorder %s16_s13, %s155_s21  ;;  %p161_p5 = scmp.lt.s32.totalorder %s155_s21, %s155_s21 }
   0xb   :  { %p162_p6 = por %p161_p5, %p160_p4 }
   0xd   :  { %p163_p7 = pnand %p162_p6, %p156_p3 }
   0xf   :  { %166 = shalt.err (!%p163_p7)
}
  0x10   :  { %s194_s22 = smov 128   ;;  %s195_s23 = smov 8  }
  0x11   :  { %21 = dma.hbm_to_vmem [thread:$0]  %s267_s0, 256, %s16_s13, [#allocation3], %s194_s22, %s194_s22, %s195_s23  }
  0x12   :  { %189 = dma.done.wait [#allocation3], 256  }
  0x13   :  { %190 = vsyncadd [#allocation3], 4294967040  ;;  %vm37_vm0 = vcmask 1043456   ;;  %v29_v0 = vld [vmem:[#allocation2] sm:$0xff]  ;;  %v30_v1 = vld [vmem:[#allocation2 + $0x8] sm:$0xff]  ;;  %v54_v15 = vlaneseq  ;;  %v197_v37 = vmov 0  }
  0x14   :  { %v33_v2 = vcombine.high %v29_v0, %v29_v0  ;;  %v34_v3 = vcombine.high %v30_v1, %v30_v1  ;;  %v38_v4 = vsel %vm37_vm0, %v29_v0, 0.0  ;;  %v39_v5 = vsel %vm37_vm0, %v30_v1, 0.0  ;;  %139 = vset.pattern.permute.xlu1 %v197_v37  ;;  %140 = vset.pattern.permute.xlu0 %v197_v37  ;;  %v81_v41 = vld [vmem:[%s268_s1] sm:$0xf]  ;;  %s198_s29 = smov [#allocation5]  }
  0x15   :  { %v40_v6 = vadd.f32 %v39_v5, %v38_v4  ;;  %v196_v13 = vmov 839922192   ;;  %v55_v17 = vshrl.u32 %v54_v15, 7  ;;  %v85_v44 = vld [vmem:[%s269_s2] sm:$0xf]  ;;  %s121_s30 = sshll.u32 %s198_s29, 4  ;;  %s122_s30 = int_to_ptr.vmem [resolvable:$true] %s121_s30 }
  0x16   :  { %v41_v7 = vsel %vm37_vm0, %v33_v2, 0.0  ;;  %v42_v8 = vsel %vm37_vm0, %v34_v3, 0.0  ;;  %v52_v14 = vunpack.c.l.s4 %v196_v13  ;;  %s167_s1 = scalar_lea.vmem %s122_s30, 256  ;;  %p172_p9 = scmp.lt.s32.totalorder %s122_s30, %s122_s30 }
  0x17   :  { %v43_v9 = vadd.f32 %v42_v8, %v41_v7  ;;  %v44_v10 = vsel %vm37_vm0, %v40_v6, 0.0  ;;  %p168_p8 = scmp.ne.s32.totalorder %s122_s30, %s167_s1  ;;  %p173_p10 = scmp.lt.s32.totalorder %s167_s1, %s167_s1 }
  0x18   :  { %v53_v16 = vunpack.c.0.s8 %v52_v14 }
  0x19   :  { %v45_v11 = vsel %vm37_vm0, %v43_v9, 0.0  ;;  %p174_p11 = por %p173_p10, %p172_p9 }
  0x1a   :  { %v46_v12 = vadd.f32 %v45_v11, %v44_v10  ;;  %v56_v18 = vsub.s32 %v53_v16, %v55_v17 }
  0x1b   :  { %p175_p12 = pnand %p174_p11, %p168_p8 }
  0x1c   :  { %47 = vadd.xlane.f32.xlu0 %v46_v12 }
  0xa9   :  { %v48_v19 = vpop.xlane.xlu0 %47 }
  0xaa   :  { %v49_v20 = vmul.f32 0.001953125, %v48_v19 }
  0xac   :  { %v57_v21 = vrot.slane %v49_v20, %v56_v18 }
  0xae   :  { %v59_v22 = vsub.f32 %v29_v0, %v57_v21  ;;  %v60_v23 = vsub.f32 %v30_v1, %v57_v21 }
  0xb0   :  { %v61_v24 = vmul.f32 %v59_v22, %v59_v22  ;;  %v62_v25 = vmul.f32 %v60_v23, %v60_v23 }
  0xb2   :  { %v65_v26 = vcombine.high %v61_v24, %v61_v24  ;;  %v66_v27 = vcombine.high %v62_v25, %v62_v25  ;;  %v69_v28 = vsel %vm37_vm0, %v61_v24, 0.0  ;;  %v70_v29 = vsel %vm37_vm0, %v62_v25, 0.0 }
  0xb3   :  { %v71_v30 = vadd.f32 %v70_v29, %v69_v28 }
  0xb4   :  { %v72_v31 = vsel %vm37_vm0, %v65_v26, 0.0  ;;  %v73_v32 = vsel %vm37_vm0, %v66_v27, 0.0 }
  0xb5   :  { %v74_v33 = vadd.f32 %v73_v32, %v72_v31  ;;  %v75_v34 = vsel %vm37_vm0, %v71_v30, 0.0 }
  0xb7   :  { %v76_v35 = vsel %vm37_vm0, %v74_v33, 0.0 }
  0xb8   :  { %v77_v36 = vadd.f32 %v76_v35, %v75_v34 }
  0xba   :  { %78 = vadd.xlane.f32.xlu0 %v77_v36 }
 0x147   :  { %v79_v38 = vpop.xlane.xlu0 %78 }
 0x148   :  { %v80_v39 = vmul.f32 0.001953125, %v79_v38 }
 0x14a   :  { %v82_v40 = vadd.f32 1e-05, %v80_v39 }
 0x14c   :  { %143 = vrsqrt.f32 %v82_v40 }
 0x156   :  { %v144_v42 = vpop.eup %143 }
 0x157   :  { %v84_v43 = vmul.f32 %v144_v42, %v81_v41 }
 0x159   :  { %88 = vperm.xlu1 %139, %v84_v43  }
 0x15d   :  { %102 = vperm.xlu1 %139, %v85_v44  }
 0x1d8   :  { %v89_v45 = vpop.permute.xlu1 %88 }
 0x1d9   :  { %v96_v46 = vrot.slane %v89_v45, %v56_v18 }
 0x1db   :  { %v98_v48 = vmul.f32 %v96_v46, %v59_v22  ;;  %v99_v49 = vmul.f32 %v96_v46, %v60_v23 }
 0x1dc   :  { %v103_v47 = vpop.permute.xlu1 %102 }
 0x1dd   :  { %v110_v50 = vrot.slane %v103_v47, %v56_v18 }
 0x1df   :  { %v112_v51 = vadd.f32 %v110_v50, %v98_v48  ;;  %v113_v52 = vadd.f32 %v110_v50, %v99_v49 }
 0x1e1   :  { %114 = vst [vmem:[#allocation5] sm:$0xff] %v112_v51  ;;  %115 = vst [vmem:[#allocation5 + $0x8] sm:$0xff] %v113_v52 }
 0x1e2   :  { %178 = shalt.err (!%p175_p12)
}
 0x1e3   :  { %s179_s5 = scalar_lea.hbm %s270_s3, 256 }
 0x1e4   :  { %p180_p13 = scmp.ne.s32.totalorder %s270_s3, %s179_s5  ;;  %p183_p0 = scmp.lt.u32.totalorder %s179_s5, %s270_s3 }
 0x1e6   :  { %p185_p1 = pnand %p183_p0, %p180_p13 }
 0x1e8   :  { %188 = shalt.err (!%p185_p1)
}
 0x1e9   :  { %127 = dma.vmem_to_hbm [thread:$0]  %s122_s30, 256, %s270_s3, [#allocation4], %s194_s22, %s194_s22, %s195_s23  }
 0x1ea   :  { %191 = dma.done.wait [#allocation4], 256  }
 0x1eb   :  { %192 = vsyncadd [#allocation4], 4294967040 }
 0x1ec   :  { %131 = vsyncpa [#allocation3], 1 }
 0x1ed   :  { %132 = vsyncpa [#allocation4], 1 }

</bundles_post_ra>
